<compile_context>
chip_gen: v7x
topology: tpu7x:2x2x1
jax: 0.10.0
libtpu: 0.0.40
codegen_flags: <defaults>
</compile_context>

<pallas_src>
import functools

import numpy as np
import jax
import jax.numpy as jnp
from jax import lax
from jax.experimental import pallas as pl
from jax.experimental.pallas import tpu as pltpu


# ----------------------------- fused kernel ---------------------------------


def _fused_block_kernel(x_ref, y_ref, lr_ref, wblk_ref, bcat_ref, lcat_ref,
                        mask_ref, out_ref, patch_ref, *, H, W):
    """out^T = x^T + (-0.3*[L65^T | LA^T]) @ relu(Wblk @ im2col(Res) + b).

    x_ref:    (band, HW)      spectral image, pixels on lanes
    y_ref:    (8, HW)         [Y65^T ; YA^T ; 0 ; 0]
    lr_ref:   (8, band)       [(L65 R)^T ; (LA R)^T ; 0 ; 0]
    wblk_ref: (2*band, 72)    block conv weights (1x1 conv folded in)
    bcat_ref: (2*band, 1)     folded bias
    lcat_ref: (band, 2*band)  -0.3 * [L65^T | LA^T]
    mask_ref: (16, HW)        zero-padding boundary mask, one row per 3x3 tap
    patch_ref:(72, HW)        VMEM scratch holding the im2col patches
    """
    HW = H * W
    xT = x_ref[...]                                                # (band, HW)

    # Both spectral residuals with a single matmul: rows 0:3 = Res65^T,
    # rows 3:6 = ResA^T, rows 6:8 are structural zeros (full 8-row tile).
    res = jnp.dot(lr_ref[...], xT,
                  preferred_element_type=jnp.float32) - y_ref[...]  # (8, HW)

    # im2col for the 3x3 conv: a spatial shift of the flattened image is a
    # lane roll (XLU, off the VALU critical path) + a precomputed boundary
    # mask row (the conv's zero padding) broadcast over the 8 sublanes.
    # Each aligned 8-row block of the patch buffer is one tap, both branches.
    k = 0
    for dy in range(3):
        for dx in range(3):
            s = (dy - 1) * W + (dx - 1)
            if s == 0:
                # Center tap: no shift, mask is all-ones.
                patch_ref[8 * k:8 * (k + 1), :] = res
            else:
                rolled = pltpu.roll(res, (-s) % HW, axis=1)
                patch_ref[8 * k:8 * (k + 1), :] = (
                    rolled * mask_ref[k:k + 1, :])
            k += 1

    # Conv3x3 + folded Conv1x1 for BOTH branches as one block matmul.
    h = jnp.dot(wblk_ref[...], patch_ref[...],
                preferred_element_type=jnp.float32) + bcat_ref[...]  # (2b, HW)
    h = jnp.maximum(h, 0.0)

    # Back-project both branches with -0.3*[L65^T | LA^T] and combine.
    out_ref[...] = xT + jnp.dot(lcat_ref[...], h,
                                preferred_element_type=jnp.float32)


# ----------------------------- wrapper ---------------------------------------


def model_block_forward(x, y65, ya, params):
    """x: (1, band, H, W), y65/ya: (1, 3, H, W)  ->  (1, band, H, W)."""
    rm, l65, la, w3, b3, w1, b1 = (params[k] for k in
                                   ("R", "L65", "LA", "w3", "b3", "w1", "b1"))
    band, H, W = x.shape[1], x.shape[2], x.shape[3]
    HW = H * W
    hp = lax.Precision.HIGHEST

    # ---- lane-dense activations: NCHW is already (C, H, W) -> just reshape --
    xT = x[0].reshape(band, HW)
    yT = jnp.concatenate([y65[0].reshape(3, HW), ya[0].reshape(3, HW),
                          jnp.zeros((2, HW), jnp.float32)], axis=0)   # (8, HW)

    # ---- parameter-only precomputation (exact algebraic folds) --------------
    lr65 = jnp.dot(l65, rm, precision=hp)                             # (band, 3)
    lra = jnp.dot(la, rm, precision=hp)
    lrcat = jnp.concatenate(
        [lr65.T, lra.T, jnp.zeros((2, band), jnp.float32)], axis=0)   # (8, band)

    # Fold the 1x1 conv into every 3x3 tap: w3f[dy,dx] = w3[dy,dx] @ w1.
    w3f = jnp.einsum("yxcb,bd->yxcd", w3, w1,
                     precision=hp).reshape(9, 3, band)                # (9,3,b)
    wt = jnp.transpose(w3f, (0, 2, 1))                                # (9,b,3)
    z3 = jnp.zeros((9, band, 3), jnp.float32)
    z2 = jnp.zeros((9, band, 2), jnp.float32)
    top = jnp.concatenate([wt, z3, z2], axis=2)                       # (9,b,8)
    bot = jnp.concatenate([z3, wt, z2], axis=2)                       # (9,b,8)
    wblk = jnp.concatenate([top, bot], axis=1)                        # (9,2b,8)
    wblk = jnp.transpose(wblk, (1, 0, 2)).reshape(2 * band, 72)       # (2b,72)

    bf = jnp.dot(b3, w1, precision=hp) + b1                           # (1, band)
    bcat = jnp.concatenate([bf, bf], axis=1).reshape(2 * band, 1)     # (2b, 1)
    # Fold the -0.3 residual scale into the projection (parameter-only fold).
    lcat = -0.3 * jnp.concatenate([l65.T, la.T], axis=1)              # (b, 2b)

    # Boundary masks for the 9 taps (the conv's zero padding); pure constants.
    # One row per tap (broadcast over sublanes in-kernel), padded to 16 rows.
    rows = np.arange(HW) // W
    cols = np.arange(HW) % W
    masks_np = np.zeros((16, HW), np.float32)
    k = 0
    for dy in range(3):
        for dx in range(3):
            ok = ((rows + dy - 1 >= 0) & (rows + dy - 1 < H) &
                  (cols + dx - 1 >= 0) & (cols + dx - 1 < W))
            masks_np[k] = ok.astype(np.float32)
            k += 1
    masks = jnp.asarray(masks_np)                                     # (16, HW)

    vmem = functools.partial(pl.BlockSpec, memory_space=pltpu.MemorySpace.VMEM)
    outT = pl.pallas_call(
        functools.partial(_fused_block_kernel, H=H, W=W),
        out_shape=jax.ShapeDtypeStruct((band, HW), jnp.float32),
        in_specs=[vmem()] * 7,
        out_specs=vmem(),
        scratch_shapes=[pltpu.VMEM((72, HW), jnp.float32)],
    )(xT, yT, lrcat, wblk, bcat, lcat, masks)

    # TODO(synk): for large frames, add a row-tiled grid (dimension_semantics
    # ("parallel",)) with a 1-row halo so the work shards across v7x's 2 TCs.
    return outT.reshape(1, band, H, W)


# ----------------------------- pure-JAX reference ----------------------------


def reference_forward(x, y65, ya, params):
    rm, l65, la, w3, b3, w1, b1 = (params[k] for k in
                                   ("R", "L65", "LA", "w3", "b3", "w1", "b1"))
    hp = lax.Precision.HIGHEST
    dn = ("NCHW", "HWIO", "NCHW")

    def lop(hsi, lm):
        return jnp.einsum("chw,cd->dhw", hsi[0], lm, precision=hp)[None]

    def rop(hsi):
        return jnp.einsum("chw,cd->dhw", hsi[0], rm, precision=hp)[None]

    def rt(z):
        y = lax.conv_general_dilated(z, w3, (1, 1), "SAME",
                                     dimension_numbers=dn, precision=hp)
        y = y + b3.reshape(1, -1, 1, 1)
        y = lax.conv_general_dilated(y, w1[None, None], (1, 1), "SAME",
                                     dimension_numbers=dn, precision=hp)
        y = y + b1.reshape(1, -1, 1, 1)
        return jnp.maximum(y, 0.0)

    res65 = rop(lop(x, l65)) - y65
    resa = rop(lop(x, la)) - ya
    inv65 = lop(rt(res65), l65)
    inva = lop(rt(resa), la)
    return x - 0.3 * (inva + inv65)


# ----------------------------- main -------------------------------------------


if __name__ == "__main__":
    band, H, W = 8, 16, 16

    key = jax.random.PRNGKey(0)
    ks = jax.random.split(key, 10)
    params = {
        "R":   0.1 * jax.random.normal(ks[0], (band, 3), jnp.float32),
        "L65": 0.1 * jax.random.normal(ks[1], (band, band), jnp.float32),
        "LA":  0.1 * jax.random.normal(ks[2], (band, band), jnp.float32),
        # conv weights stored HWIO: (kh, kw, cin, cout); 1x1 conv as (cin, cout)
        "w3":  0.1 * jax.random.normal(ks[3], (3, 3, 3, band), jnp.float32),
        "b3":  0.1 * jax.random.normal(ks[4], (1, band), jnp.float32),
        "w1":  0.1 * jax.random.normal(ks[5], (band, band), jnp.float32),
        "b1":  0.1 * jax.random.normal(ks[6], (1, band), jnp.float32),
    }
    x = jax.random.normal(ks[7], (1, band, H, W), jnp.float32)
    y65 = jax.random.normal(ks[8], (1, 3, H, W), jnp.float32)
    ya = jax.random.normal(ks[9], (1, 3, H, W), jnp.float32)

    out = jax.jit(model_block_forward)(x, y65, ya, params)
    out = jax.block_until_ready(out)

    ref = reference_forward(x, y65, ya, params)
    assert out.shape == x.shape and out.dtype == jnp.float32
    assert jnp.allclose(out, ref, atol=2e-3, rtol=2e-3), "mismatch vs reference"

    print("KERNEL_OK")
</pallas_src>

<mosaic_0001>
module attributes {stable_mosaic.version = 11 : i64} {
  func.func @_fused_block_kernel(%arg0: memref<8x256xf32, #tpu.memory_space<vmem>>, %arg1: memref<8x256xf32, #tpu.memory_space<vmem>>, %arg2: memref<8x8xf32, #tpu.memory_space<vmem>>, %arg3: memref<16x72xf32, #tpu.memory_space<vmem>>, %arg4: memref<16x1xf32, #tpu.memory_space<vmem>>, %arg5: memref<8x16xf32, #tpu.memory_space<vmem>>, %arg6: memref<16x256xf32, #tpu.memory_space<vmem>>, %arg7: memref<8x256xf32, #tpu.memory_space<vmem>>, %arg8: memref<72x256xf32, #tpu.memory_space<vmem>>) attributes {dimension_semantics = [], scalar_prefetch = 0 : i64, scratch_operands = 1 : i64, tpu.core_type = #tpu.core_type<tc>} {
    %c0 = arith.constant 0 : index
    %c0_0 = arith.constant 0 : index
    %0 = vector.load %arg0[%c0, %c0_0] : memref<8x256xf32, #tpu.memory_space<vmem>>, vector<8x256xf32>
    %c0_1 = arith.constant 0 : index
    %c0_2 = arith.constant 0 : index
    %1 = vector.load %arg2[%c0_1, %c0_2] : memref<8x8xf32, #tpu.memory_space<vmem>>, vector<8x8xf32>
    %cst = arith.constant dense<0.000000e+00> : vector<8x256xf32>
    %2 = tpu.matmul %1, %0, %cst {dimension_numbers = #tpu.dot_dimension_numbers<[1], [0], [0], [1], [0, 0, 1, 1], [], []>} : vector<8x8xf32>, vector<8x256xf32>, vector<8x256xf32> -> vector<8x256xf32>
    %c0_3 = arith.constant 0 : index
    %c0_4 = arith.constant 0 : index
    %3 = vector.load %arg1[%c0_3, %c0_4] : memref<8x256xf32, #tpu.memory_space<vmem>>, vector<8x256xf32>
    %4 = arith.subf %2, %3 : vector<8x256xf32>
    %c17_i32 = arith.constant 17 : i32
    %5 = tpu.dynamic_rotate %4 by %c17_i32 dim 1 : vector<8x256xf32>, i32 -> vector<8x256xf32>
    %c0_5 = arith.constant 0 : index
    %c0_6 = arith.constant 0 : index
    %6 = vector.load %arg6[%c0_5, %c0_6] : memref<16x256xf32, #tpu.memory_space<vmem>>, vector<1x256xf32>
    %7 = vector.broadcast %6 : vector<1x256xf32> to vector<8x256xf32>
    %8 = arith.mulf %5, %7 : vector<8x256xf32>
    %c0_7 = arith.constant 0 : index
    %c0_8 = arith.constant 0 : index
    %9 = vector.load %arg8[%c0_7, %c0_8] : memref<72x256xf32, #tpu.memory_space<vmem>>, vector<8x256xf32>
    tpu.vector_store %arg8[%c0_7, %c0_8], %8 {strides = array<i32>} : memref<72x256xf32, #tpu.memory_space<vmem>>, vector<8x256xf32>,
    %c16_i32 = arith.constant 16 : i32
    %10 = tpu.dynamic_rotate %4 by %c16_i32 dim 1 : vector<8x256xf32>, i32 -> vector<8x256xf32>
    %c1 = arith.constant 1 : index
    %c0_9 = arith.constant 0 : index
    %11 = vector.load %arg6[%c1, %c0_9] : memref<16x256xf32, #tpu.memory_space<vmem>>, vector<1x256xf32>
    %12 = vector.broadcast %11 : vector<1x256xf32> to vector<8x256xf32>
    %13 = arith.mulf %10, %12 : vector<8x256xf32>
    %c8 = arith.constant 8 : index
    %c0_10 = arith.constant 0 : index
    %14 = vector.load %arg8[%c8, %c0_10] : memref<72x256xf32, #tpu.memory_space<vmem>>, vector<8x256xf32>
    tpu.vector_store %arg8[%c8, %c0_10], %13 {strides = array<i32>} : memref<72x256xf32, #tpu.memory_space<vmem>>, vector<8x256xf32>,
    %c15_i32 = arith.constant 15 : i32
    %15 = tpu.dynamic_rotate %4 by %c15_i32 dim 1 : vector<8x256xf32>, i32 -> vector<8x256xf32>
    %c2 = arith.constant 2 : index
    %c0_11 = arith.constant 0 : index
    %16 = vector.load %arg6[%c2, %c0_11] : memref<16x256xf32, #tpu.memory_space<vmem>>, vector<1x256xf32>
    %17 = vector.broadcast %16 : vector<1x256xf32> to vector<8x256xf32>
    %18 = arith.mulf %15, %17 : vector<8x256xf32>
    %c16 = arith.constant 16 : index
    %c0_12 = arith.constant 0 : index
    %19 = vector.load %arg8[%c16, %c0_12] : memref<72x256xf32, #tpu.memory_space<vmem>>, vector<8x256xf32>
    tpu.vector_store %arg8[%c16, %c0_12], %18 {strides = array<i32>} : memref<72x256xf32, #tpu.memory_space<vmem>>, vector<8x256xf32>,
    %c1_i32 = arith.constant 1 : i32
    %20 = tpu.dynamic_rotate %4 by %c1_i32 dim 1 : vector<8x256xf32>, i32 -> vector<8x256xf32>
    %c3 = arith.constant 3 : index
    %c0_13 = arith.constant 0 : index
    %21 = vector.load %arg6[%c3, %c0_13] : memref<16x256xf32, #tpu.memory_space<vmem>>, vector<1x256xf32>
    %22 = vector.broadcast %21 : vector<1x256xf32> to vector<8x256xf32>
    %23 = arith.mulf %20, %22 : vector<8x256xf32>
    %c24 = arith.constant 24 : index
    %c0_14 = arith.constant 0 : index
    %24 = vector.load %arg8[%c24, %c0_14] : memref<72x256xf32, #tpu.memory_space<vmem>>, vector<8x256xf32>
    tpu.vector_store %arg8[%c24, %c0_14], %23 {strides = array<i32>} : memref<72x256xf32, #tpu.memory_space<vmem>>, vector<8x256xf32>,
    %c32 = arith.constant 32 : index
    %c0_15 = arith.constant 0 : index
    %25 = vector.load %arg8[%c32, %c0_15] : memref<72x256xf32, #tpu.memory_space<vmem>>, vector<8x256xf32>
    tpu.vector_store %arg8[%c32, %c0_15], %4 {strides = array<i32>} : memref<72x256xf32, #tpu.memory_space<vmem>>, vector<8x256xf32>,
    %c255_i32 = arith.constant 255 : i32
    %26 = tpu.dynamic_rotate %4 by %c255_i32 dim 1 : vector<8x256xf32>, i32 -> vector<8x256xf32>
    %c5 = arith.constant 5 : index
    %c0_16 = arith.constant 0 : index
    %27 = vector.load %arg6[%c5, %c0_16] : memref<16x256xf32, #tpu.memory_space<vmem>>, vector<1x256xf32>
    %28 = vector.broadcast %27 : vector<1x256xf32> to vector<8x256xf32>
    %29 = arith.mulf %26, %28 : vector<8x256xf32>
    %c40 = arith.constant 40 : index
    %c0_17 = arith.constant 0 : index
    %30 = vector.load %arg8[%c40, %c0_17] : memref<72x256xf32, #tpu.memory_space<vmem>>, vector<8x256xf32>
    tpu.vector_store %arg8[%c40, %c0_17], %29 {strides = array<i32>} : memref<72x256xf32, #tpu.memory_space<vmem>>, vector<8x256xf32>,
    %c241_i32 = arith.constant 241 : i32
    %31 = tpu.dynamic_rotate %4 by %c241_i32 dim 1 : vector<8x256xf32>, i32 -> vector<8x256xf32>
    %c6 = arith.constant 6 : index
    %c0_18 = arith.constant 0 : index
    %32 = vector.load %arg6[%c6, %c0_18] : memref<16x256xf32, #tpu.memory_space<vmem>>, vector<1x256xf32>
    %33 = vector.broadcast %32 : vector<1x256xf32> to vector<8x256xf32>
    %34 = arith.mulf %31, %33 : vector<8x256xf32>
    %c48 = arith.constant 48 : index
    %c0_19 = arith.constant 0 : index
    %35 = vector.load %arg8[%c48, %c0_19] : memref<72x256xf32, #tpu.memory_space<vmem>>, vector<8x256xf32>
    tpu.vector_store %arg8[%c48, %c0_19], %34 {strides = array<i32>} : memref<72x256xf32, #tpu.memory_space<vmem>>, vector<8x256xf32>,
    %c240_i32 = arith.constant 240 : i32
    %36 = tpu.dynamic_rotate %4 by %c240_i32 dim 1 : vector<8x256xf32>, i32 -> vector<8x256xf32>
    %c7 = arith.constant 7 : index
    %c0_20 = arith.constant 0 : index
    %37 = vector.load %arg6[%c7, %c0_20] : memref<16x256xf32, #tpu.memory_space<vmem>>, vector<1x256xf32>
    %38 = vector.broadcast %37 : vector<1x256xf32> to vector<8x256xf32>
    %39 = arith.mulf %36, %38 : vector<8x256xf32>
    %c56 = arith.constant 56 : index
    %c0_21 = arith.constant 0 : index
    %40 = vector.load %arg8[%c56, %c0_21] : memref<72x256xf32, #tpu.memory_space<vmem>>, vector<8x256xf32>
    tpu.vector_store %arg8[%c56, %c0_21], %39 {strides = array<i32>} : memref<72x256xf32, #tpu.memory_space<vmem>>, vector<8x256xf32>,
    %c239_i32 = arith.constant 239 : i32
    %41 = tpu.dynamic_rotate %4 by %c239_i32 dim 1 : vector<8x256xf32>, i32 -> vector<8x256xf32>
    %c8_22 = arith.constant 8 : index
    %c0_23 = arith.constant 0 : index
    %42 = vector.load %arg6[%c8_22, %c0_23] : memref<16x256xf32, #tpu.memory_space<vmem>>, vector<1x256xf32>
    %43 = vector.broadcast %42 : vector<1x256xf32> to vector<8x256xf32>
    %44 = arith.mulf %41, %43 : vector<8x256xf32>
    %c64 = arith.constant 64 : index
    %c0_24 = arith.constant 0 : index
    %45 = vector.load %arg8[%c64, %c0_24] : memref<72x256xf32, #tpu.memory_space<vmem>>, vector<8x256xf32>
    tpu.vector_store %arg8[%c64, %c0_24], %44 {strides = array<i32>} : memref<72x256xf32, #tpu.memory_space<vmem>>, vector<8x256xf32>,
    %c0_25 = arith.constant 0 : index
    %c0_26 = arith.constant 0 : index
    %46 = vector.load %arg3[%c0_25, %c0_26] : memref<16x72xf32, #tpu.memory_space<vmem>>, vector<16x72xf32>
    %c0_27 = arith.constant 0 : index
    %c0_28 = arith.constant 0 : index
    %47 = vector.load %arg8[%c0_27, %c0_28] : memref<72x256xf32, #tpu.memory_space<vmem>>, vector<72x256xf32>
    %cst_29 = arith.constant dense<0.000000e+00> : vector<16x256xf32>
    %48 = tpu.matmul %46, %47, %cst_29 {dimension_numbers = #tpu.dot_dimension_numbers<[1], [0], [0], [1], [0, 0, 1, 1], [], []>} : vector<16x72xf32>, vector<72x256xf32>, vector<16x256xf32> -> vector<16x256xf32>
    %c0_30 = arith.constant 0 : index
    %c0_31 = arith.constant 0 : index
    %49 = vector.load %arg4[%c0_30, %c0_31] : memref<16x1xf32, #tpu.memory_space<vmem>>, vector<16x1xf32>
    %50 = vector.broadcast %49 : vector<16x1xf32> to vector<16x256xf32>
    %51 = arith.addf %48, %50 : vector<16x256xf32>
    %cst_32 = arith.constant 0.000000e+00 : f32
    %52 = vector.broadcast %cst_32 : f32 to vector<16x256xf32>
    %53 = arith.maximumf %51, %52 : vector<16x256xf32>
    %c0_33 = arith.constant 0 : index
    %c0_34 = arith.constant 0 : index
    %54 = vector.load %arg5[%c0_33, %c0_34] : memref<8x16xf32, #tpu.memory_space<vmem>>, vector<8x16xf32>
    %cst_35 = arith.constant dense<0.000000e+00> : vector<8x256xf32>
    %55 = tpu.matmul %54, %53, %cst_35 {dimension_numbers = #tpu.dot_dimension_numbers<[1], [0], [0], [1], [0, 0, 1, 1], [], []>} : vector<8x16xf32>, vector<16x256xf32>, vector<8x256xf32> -> vector<8x256xf32>
    %56 = arith.addf %0, %55 : vector<8x256xf32>
    %c0_36 = arith.constant 0 : index
    %c0_37 = arith.constant 0 : index
    %57 = vector.load %arg7[%c0_36, %c0_37] : memref<8x256xf32, #tpu.memory_space<vmem>>, vector<8x256xf32>
    tpu.vector_store %arg7[%c0_36, %c0_37], %56 {strides = array<i32>} : memref<8x256xf32, #tpu.memory_space<vmem>>, vector<8x256xf32>,
    return
  }
}

</mosaic_0001>

<bundles_post_ra>
// kernel: squeeze.5
= control target key start
LH: loop header
LB: loop body
LE: loop exit
PB: predicated region body
PF: predicated region fallthrough
CT: control target
= control target key end

     0   :  { %vm5_vm0 = vcmask 1045508   ;;  %s14_s6 = smov 3  ;;  %s17_s7 = smov 12  ;;  %vm19_vm1 = vcmask 1043458   ;;  %vm7_vm2 = vcmask 130048   ;;  %vm28_vm3 = vcmask 1048448   ;;  %s296_s0 = inlined_call_operand.vmem [shape: f32[1,3,16,16], index: 0, kind: input, shape index: {}]   ;;  %s297_s1 = inlined_call_operand.vmem [shape: f32[3,256], index: 1, kind: output, shape index: {}]  }
   0x1   :  { %v157_v0 = vld [vmem:[%s296_s0 + $0x7] ss:$16 sm:%s14_s6]   ;;  %s22_s12 = smov 48  ;;  %s52_s15 = smov 3  ;;  %vm47_vm4 = vcmask 917248   ;;  %vm66_vm5 = vcmask 786048  }
   0x2   :  { %v158_v1 = vld [vmem:[%s296_s0 + $0x57] ss:$-24 sm:%s17_s7]   ;;  %s55_s16 = smov 12  ;;  %v163_v5 = vld [vmem:[%s296_s0 + $0x5] ss:$16 sm:%s52_s15]   ;;  %s60_s21 = smov 48 }
   0x3   :  { %v20_v2 = vsel %vm19_vm1, %v158_v1, %v157_v0  ;;  %v159_v3 = vld [vmem:[%s296_s0 - $0x21] ss:$16 sm:%s22_s12]   ;;  %v164_v6 = vld [vmem:[%s296_s0 + $0x55] ss:$-24 sm:%s55_s16]   ;;  %s186_s22 = smov 112   ;;  %s33_s25 = smov 3 }
   0x4   :  { %v25_v4 = vsel %vm5_vm0, %v159_v3, %v20_v2  ;;  %v58_v7 = vsel %vm19_vm1, %v164_v6, %v163_v5  ;;  %v165_v8 = vld [vmem:[%s296_s0 - $0x23] ss:$16 sm:%s60_s21]   ;;  %s36_s26 = smov 12  ;;  %v160_v10 = vld [vmem:[%s296_s0 + $0x6] ss:$16 sm:%s33_s25]   ;;  %s41_s2 = smov 48 }
   0x5   :  { %26 = vrot.lane.b32.xlu0 %v25_v4, %s186_s22  ;;  %v63_v9 = vsel %vm5_vm0, %v165_v8, %v58_v7  ;;  %v161_v11 = vld [vmem:[%s296_s0 + $0x56] ss:$-24 sm:%s36_s26]   ;;  %s187_s3 = smov 80   ;;  %s71_s6 = smov 3  ;;  %vm85_vm6 = vcmask 654848   ;;  %vm104_vm7 = vcmask 523648  }
   0x6   :  { %64 = vrot.lane.b32.xlu1 %v63_v9, %s187_s3  ;;  %v39_v12 = vsel %vm19_vm1, %v161_v11, %v160_v10  ;;  %v162_v13 = vld [vmem:[%s296_s0 - $0x22] ss:$16 sm:%s41_s2]   ;;  %s74_s7 = smov 12  ;;  %s79_s12 = smov 48  ;;  %vm123_vm8 = vcmask 392448   ;;  %vm142_vm9 = vcmask 261248  }
   0x7   :  { %v44_v14 = vsel %vm5_vm0, %v162_v13, %v39_v12  ;;  %v166_v15 = vld [vmem:[%s296_s0 + $0x4] ss:$16 sm:%s71_s6]   ;;  %s188_s13 = smov 96   ;;  %v168_v18 = vld [vmem:[%s296_s0 - $0x24] ss:$16 sm:%s79_s12]   ;;  %s90_s16 = smov 3 }
   0x8   :  { %v167_v16 = vld [vmem:[%s296_s0 + $0x54] ss:$-24 sm:%s74_s7]   ;;  %s93_s17 = smov 12  ;;  %v169_v20 = vld [vmem:[%s296_s0 + $0x3] ss:$16 sm:%s90_s16]   ;;  %s98_s22 = smov 48 }
   0x9   :  { %45 = vrot.lane.b32.xlu0 %v44_v14, %s188_s13  ;;  %v77_v17 = vsel %vm19_vm1, %v167_v16, %v166_v15  ;;  %v170_v21 = vld [vmem:[%s296_s0 + $0x53] ss:$-24 sm:%s93_s17]   ;;  %s189_s23 = smov 64   ;;  %s109_s26 = smov 3 }
   0xa   :  { %v82_v19 = vsel %vm5_vm0, %v168_v18, %v77_v17  ;;  %v96_v22 = vsel %vm19_vm1, %v170_v21, %v169_v20  ;;  %v171_v23 = vld [vmem:[%s296_s0 - $0x25] ss:$16 sm:%s98_s22]   ;;  %s112_s27 = smov 12  ;;  %v172_v25 = vld [vmem:[%s296_s0 + $0x2] ss:$16 sm:%s109_s26]   ;;  %s117_s3 = smov 48 }
   0xb   :  { %83 = vrot.lane.b32.xlu1 %v82_v19, %s189_s23  ;;  %v101_v24 = vsel %vm5_vm0, %v171_v23, %v96_v22  ;;  %v173_v26 = vld [vmem:[%s296_s0 + $0x52] ss:$-24 sm:%s112_s27]   ;;  %s190_s4 = smov 48   ;;  %s128_s7 = smov 3 }
   0xc   :  { %v115_v27 = vsel %vm19_vm1, %v173_v26, %v172_v25  ;;  %v174_v28 = vld [vmem:[%s296_s0 - $0x26] ss:$16 sm:%s117_s3]   ;;  %s131_s8 = smov 12  ;;  %v175_v30 = vld [vmem:[%s296_s0 + $0x1] ss:$16 sm:%s128_s7]   ;;  %s136_s13 = smov 48 }
   0xd   :  { %102 = vrot.lane.b32.xlu0 %v101_v24, %s190_s4  ;;  %v120_v29 = vsel %vm5_vm0, %v174_v28, %v115_v27  ;;  %v176_v31 = vld [vmem:[%s296_s0 + $0x51] ss:$-24 sm:%s131_s8]   ;;  %s191_s14 = smov 32   ;;  %v2_v34 = vld [vmem:[%s296_s0] ss:$8 sm:$0xf]  }
   0xe   :  { %v134_v32 = vsel %vm19_vm1, %v176_v31, %v175_v30  ;;  %v177_v33 = vld [vmem:[%s296_s0 - $0x27] ss:$16 sm:%s136_s13]   ;;  %s3_s19 = smov 48 }
   0xf   :  { %121 = vrot.lane.b32.xlu1 %v120_v29, %s191_s14  ;;  %v139_v35 = vsel %vm5_vm0, %v177_v33, %v134_v32  ;;  %v4_v36 = vld [vmem:[%s296_s0] ss:$8 sm:%s3_s19]   ;;  %s192_s0 = smov 16  }
  0x10   :  { %v6_v37 = vsel %vm5_vm0, %v4_v36, %v2_v34 }
  0x11   :  { %140 = vrot.lane.b32.xlu0 %v139_v35, %s192_s0  ;;  %8 = vst.msk [vmem:[#allocation0] ss:$8 sm:$0x3] %vm7_vm2, %v6_v37   ;;  %10 = vst.msk [vmem:[#allocation0 - $0xf] ss:$8 sm:$0xc] %vm7_vm2, %v6_v37  }
  0x12   :  { %12 = vst.msk [vmem:[#allocation0 - $0x1e] ss:$8 sm:$0x30] %vm7_vm2, %v6_v37  }
  0x77   :  { %v27_v38 = vpop.permute.xlu0 %26  }
  0x78   :  { %29 = vst.msk [vmem:[#allocation0] sm:$0x7] %vm28_vm3, %v27_v38   ;;  %31 = vst.msk [vmem:[#allocation0 + $0x5] sm:$0x38] %vm28_vm3, %v27_v38   ;;  %v65_v39 = vpop.permute.xlu1 %64  }
  0x7b   :  { %v46_v40 = vpop.permute.xlu0 %45  }
  0x7c   :  { %48 = vst.msk [vmem:[#allocation0] sm:$0x7] %vm47_vm4, %v46_v40   ;;  %50 = vst.msk [vmem:[#allocation0 + $0x5] sm:$0x38] %vm47_vm4, %v46_v40  }
  0x7d   :  { %67 = vst.msk [vmem:[#allocation0] sm:$0x7] %vm66_vm5, %v65_v39   ;;  %69 = vst.msk [vmem:[#allocation0 + $0x5] sm:$0x38] %vm66_vm5, %v65_v39   ;;  %v84_v41 = vpop.permute.xlu1 %83  }
  0x7e   :  { %86 = vst.msk [vmem:[#allocation0] sm:$0x7] %vm85_vm6, %v84_v41   ;;  %88 = vst.msk [vmem:[#allocation0 + $0x5] sm:$0x38] %vm85_vm6, %v84_v41  }
  0x7f   :  { %v103_v42 = vpop.permute.xlu0 %102  }
  0x80   :  { %105 = vst.msk [vmem:[#allocation0] sm:$0x7] %vm104_vm7, %v103_v42   ;;  %107 = vst.msk [vmem:[#allocation0 + $0x5] sm:$0x38] %vm104_vm7, %v103_v42  }
  0x81   :  { %v122_v43 = vpop.permute.xlu1 %121  }
  0x82   :  { %124 = vst.msk [vmem:[#allocation0] sm:$0x7] %vm123_vm8, %v122_v43   ;;  %126 = vst.msk [vmem:[#allocation0 + $0x5] sm:$0x38] %vm123_vm8, %v122_v43  }
  0x83   :  { %v141_v44 = vpop.permute.xlu0 %140  }
  0x84   :  { %143 = vst.msk [vmem:[#allocation0] sm:$0x7] %vm142_vm9, %v141_v44   ;;  %145 = vst.msk [vmem:[#allocation0 + $0x5] sm:$0x38] %vm142_vm9, %v141_v44  }
  0x8b   :  { %v149_v45 = vld [vmem:[#allocation0] sm:$0xf]  ;;  %v153_v46 = vld [vmem:[#allocation0 + $0x8] sm:$0xf] }
  0x8c   :  { %151 = vst [vmem:[%s297_s1] sm:$0xf] %v149_v45  ;;  %178 = vst [vmem:[%s297_s1 + $0x4] sm:$0xf] %v153_v46 }

// kernel: squeeze.4
= control target key start
LH: loop header
LB: loop body
LE: loop exit
PB: predicated region body
PF: predicated region fallthrough
CT: control target
= control target key end

     0   :  { %2 = vsyncpa [#allocation1], 0  ;;  %s201_s6 = smov [#allocation0]   ;;  %s255_s0 = inlined_call_operand.hbm [shape: f32[1,3,16,16], index: 0, kind: input, shape index: {}]   ;;  %s256_s1 = inlined_call_operand.vmem [shape: f32[3,256], index: 1, kind: output, shape index: {}]  }
   0x1   :  { %s7_s7 = sshll.u32 %s201_s6, 4  ;;  %s177_s10 = scalar_lea.hbm %s255_s0, 768  ;;  %s8_s7 = int_to_ptr.vmem [resolvable:$true] %s7_s7 }
   0x2   :  { %p178_p0 = scmp.ne.s32.totalorder %s255_s0, %s177_s10  ;;  %p181_p1 = scmp.lt.u32.totalorder %s177_s10, %s255_s0 }
   0x4   :  { %p183_p2 = pnand %p181_p1, %p178_p0 }
   0x6   :  { %186 = shalt.err (!%p183_p2)
}
   0x7   :  { %s187_s15 = scalar_lea.vmem %s8_s7, 768  ;;  %p192_p4 = scmp.lt.s32.totalorder %s8_s7, %s8_s7 }
   0x8   :  { %p188_p3 = scmp.ne.s32.totalorder %s8_s7, %s187_s15  ;;  %p193_p5 = scmp.lt.s32.totalorder %s187_s15, %s187_s15 }
   0xa   :  { %p194_p6 = por %p193_p5, %p192_p4 }
   0xc   :  { %p195_p7 = pnand %p194_p6, %p188_p3 }
   0xe   :  { %198 = shalt.err (!%p195_p7)
}
   0xf   :  { %10 = dma.hbm_to_vmem [thread:$0]  %s255_s0, 768, %s8_s7, [#allocation1]  }
  0x10   :  { %199 = dma.done.wait [#allocation1], 768  }
  0x11   :  { %200 = vsyncadd [#allocation1], 4294966528  ;;  %s24_s0 = smov 3  ;;  %s27_s18 = smov 12  ;;  %vm29_vm0 = vcmask 1043458   ;;  %vm15_vm1 = vcmask 1045508  }
  0x12   :  { %s32_s19 = smov 48  ;;  %s62_s20 = smov 3  ;;  %v25_v0 = vld [vmem:[#allocation0 + $0x7] ss:$16 sm:%s24_s0]   ;;  %vm17_vm2 = vcmask 130048   ;;  %vm38_vm3 = vcmask 1048448  }
  0x13   :  { %s65_s21 = smov 12  ;;  %s70_s22 = smov 48  ;;  %v28_v1 = vld [vmem:[#allocation0 + $0x57] ss:$-24 sm:%s27_s18]   ;;  %v63_v4 = vld [vmem:[#allocation0 + $0x5] ss:$16 sm:%s62_s20]  }
  0x14   :  { %s43_s23 = smov 3  ;;  %s46_s24 = smov 12  ;;  %v33_v2 = vld [vmem:[#allocation0 - $0x21] ss:$16 sm:%s32_s19]   ;;  %v30_v3 = vsel %vm29_vm0, %v28_v1, %v25_v0  ;;  %v66_v5 = vld [vmem:[#allocation0 + $0x55] ss:$-24 sm:%s65_s21]  }
  0x15   :  { %s51_s25 = smov 48  ;;  %s81_s26 = smov 3  ;;  %v71_v6 = vld [vmem:[#allocation0 - $0x23] ss:$16 sm:%s70_s22]   ;;  %v35_v7 = vsel %vm15_vm1, %v33_v2, %v30_v3  ;;  %v68_v8 = vsel %vm29_vm0, %v66_v5, %v63_v4  ;;  %v44_v9 = vld [vmem:[#allocation0 + $0x6] ss:$16 sm:%s43_s23]  }
  0x16   :  { %s84_s27 = smov 12  ;;  %v47_v10 = vld [vmem:[#allocation0 + $0x56] ss:$-24 sm:%s46_s24]   ;;  %s202_s28 = smov 112   ;;  %v73_v12 = vsel %vm15_vm1, %v71_v6, %v68_v8  ;;  %v82_v14 = vld [vmem:[#allocation0 + $0x4] ss:$16 sm:%s81_s26]  }
  0x17   :  { %v52_v11 = vld [vmem:[#allocation0 - $0x22] ss:$16 sm:%s51_s25]   ;;  %36 = vrot.lane.b32.xlu0 %v35_v7, %s202_s28  ;;  %v49_v13 = vsel %vm29_vm0, %v47_v10, %v44_v9  ;;  %v85_v15 = vld [vmem:[#allocation0 + $0x54] ss:$-24 sm:%s84_s27]   ;;  %s89_s29 = smov 48  ;;  %s203_s30 = smov 80  }
  0x18   :  { %74 = vrot.lane.b32.xlu1 %v73_v12, %s203_s30  ;;  %v54_v16 = vsel %vm15_vm1, %v52_v11, %v49_v13  ;;  %v87_v17 = vsel %vm29_vm0, %v85_v15, %v82_v14  ;;  %v90_v18 = vld [vmem:[#allocation0 - $0x24] ss:$16 sm:%s89_s29]   ;;  %s100_s2 = smov 3  ;;  %s103_s3 = smov 12  ;;  %vm57_vm4 = vcmask 917248   ;;  %vm76_vm5 = vcmask 786048  }
  0x19   :  { %v92_v19 = vsel %vm15_vm1, %v90_v18, %v87_v17  ;;  %v101_v20 = vld [vmem:[#allocation0 + $0x3] ss:$16 sm:%s100_s2]   ;;  %s108_s4 = smov 48  ;;  %s119_s5 = smov 3  ;;  %vm95_vm6 = vcmask 654848   ;;  %vm114_vm7 = vcmask 523648  }
  0x1a   :  { %v104_v21 = vld [vmem:[#allocation0 + $0x53] ss:$-24 sm:%s103_s3]   ;;  %s122_s6 = smov 12  ;;  %s204_s7 = smov 96   ;;  %v120_v24 = vld [vmem:[#allocation0 + $0x2] ss:$16 sm:%s119_s5]  }
  0x1b   :  { %v106_v22 = vsel %vm29_vm0, %v104_v21, %v101_v20  ;;  %v109_v23 = vld [vmem:[#allocation0 - $0x25] ss:$16 sm:%s108_s4]   ;;  %55 = vrot.lane.b32.xlu0 %v54_v16, %s204_s7  ;;  %v123_v25 = vld [vmem:[#allocation0 + $0x52] ss:$-24 sm:%s122_s6]   ;;  %s127_s8 = smov 48  ;;  %s205_s9 = smov 64  }
  0x1c   :  { %93 = vrot.lane.b32.xlu1 %v92_v19, %s205_s9  ;;  %v111_v26 = vsel %vm15_vm1, %v109_v23, %v106_v22  ;;  %v125_v27 = vsel %vm29_vm0, %v123_v25, %v120_v24  ;;  %v128_v28 = vld [vmem:[#allocation0 - $0x26] ss:$16 sm:%s127_s8]   ;;  %s138_s10 = smov 3  ;;  %s141_s11 = smov 12  ;;  %vm133_vm8 = vcmask 392448   ;;  %vm152_vm9 = vcmask 261248  }
  0x1d   :  { %v130_v29 = vsel %vm15_vm1, %v128_v28, %v125_v27  ;;  %v139_v30 = vld [vmem:[#allocation0 + $0x1] ss:$16 sm:%s138_s10]   ;;  %s146_s12 = smov 48  ;;  %s13_s13 = smov 48 }
  0x1e   :  { %v142_v31 = vld [vmem:[#allocation0 + $0x51] ss:$-24 sm:%s141_s11]   ;;  %v12_v34 = vld [vmem:[#allocation0] ss:$8 sm:$0xf]   ;;  %s206_s14 = smov 48  }
  0x1f   :  { %v144_v32 = vsel %vm29_vm0, %v142_v31, %v139_v30  ;;  %v147_v33 = vld [vmem:[#allocation0 - $0x27] ss:$16 sm:%s146_s12]   ;;  %112 = vrot.lane.b32.xlu0 %v111_v26, %s206_s14  ;;  %v14_v35 = vld [vmem:[#allocation0] ss:$8 sm:%s13_s13]   ;;  %s207_s15 = smov 32   ;;  %s208_s16 = smov 16  }
  0x20   :  { %131 = vrot.lane.b32.xlu1 %v130_v29, %s207_s15  ;;  %v149_v36 = vsel %vm15_vm1, %v147_v33, %v144_v32  ;;  %v16_v37 = vsel %vm15_vm1, %v14_v35, %v12_v34 }
  0x21   :  { %18 = vst.msk [vmem:[#allocation2] ss:$8 sm:$0x3] %vm17_vm2, %v16_v37   ;;  %20 = vst.msk [vmem:[#allocation2 - $0xf] ss:$8 sm:$0xc] %vm17_vm2, %v16_v37  }
  0x22   :  { %22 = vst.msk [vmem:[#allocation2 - $0x1e] ss:$8 sm:$0x30] %vm17_vm2, %v16_v37  }
  0x23   :  { %150 = vrot.lane.b32.xlu0 %v149_v36, %s208_s16 }
  0x89   :  { %v37_v38 = vpop.permute.xlu0 %36  }
  0x8a   :  { %v75_v39 = vpop.permute.xlu1 %74   ;;  %39 = vst.msk [vmem:[#allocation2] sm:$0x7] %vm38_vm3, %v37_v38   ;;  %41 = vst.msk [vmem:[#allocation2 + $0x5] sm:$0x38] %vm38_vm3, %v37_v38  }
  0x8d   :  { %v56_v40 = vpop.permute.xlu0 %55  }
  0x8e   :  { %58 = vst.msk [vmem:[#allocation2] sm:$0x7] %vm57_vm4, %v56_v40   ;;  %60 = vst.msk [vmem:[#allocation2 + $0x5] sm:$0x38] %vm57_vm4, %v56_v40   ;;  %v94_v41 = vpop.permute.xlu1 %93  }
  0x8f   :  { %77 = vst.msk [vmem:[#allocation2] sm:$0x7] %vm76_vm5, %v75_v39   ;;  %79 = vst.msk [vmem:[#allocation2 + $0x5] sm:$0x38] %vm76_vm5, %v75_v39  }
  0x90   :  { %96 = vst.msk [vmem:[#allocation2] sm:$0x7] %vm95_vm6, %v94_v41   ;;  %98 = vst.msk [vmem:[#allocation2 + $0x5] sm:$0x38] %vm95_vm6, %v94_v41  }
  0x91   :  { %v113_v42 = vpop.permute.xlu0 %112  }
  0x92   :  { %115 = vst.msk [vmem:[#allocation2] sm:$0x7] %vm114_vm7, %v113_v42   ;;  %117 = vst.msk [vmem:[#allocation2 + $0x5] sm:$0x38] %vm114_vm7, %v113_v42   ;;  %v132_v43 = vpop.permute.xlu1 %131  }
  0x93   :  { %134 = vst.msk [vmem:[#allocation2] sm:$0x7] %vm133_vm8, %v132_v43   ;;  %136 = vst.msk [vmem:[#allocation2 + $0x5] sm:$0x38] %vm133_vm8, %v132_v43  }
  0x95   :  { %v151_v44 = vpop.permute.xlu0 %150  }
  0x96   :  { %153 = vst.msk [vmem:[#allocation2] sm:$0x7] %vm152_vm9, %v151_v44   ;;  %155 = vst.msk [vmem:[#allocation2 + $0x5] sm:$0x38] %vm152_vm9, %v151_v44  }
  0x9d   :  { %v159_v45 = vld [vmem:[#allocation2] sm:$0xf]  ;;  %v163_v46 = vld [vmem:[#allocation2 + $0x8] sm:$0xf] }
  0x9e   :  { %161 = vst [vmem:[%s256_s1] sm:$0xf] %v159_v45  ;;  %168 = vst [vmem:[%s256_s1 + $0x4] sm:$0xf] %v163_v46 }
  0x9f   :  { %167 = vsyncpa [#allocation1], 1 }

// kernel: squeeze.3
= control target key start
LH: loop header
LB: loop body
LE: loop exit
PB: predicated region body
PF: predicated region fallthrough
CT: control target
= control target key end

     0   :  { %vm35_vm0 = vcmask 1043458   ;;  %vm40_vm1 = vcmask 1045508   ;;  %vm45_vm2 = vcmask 1047558   ;;  %s75_s6 = smov 3  ;;  %s78_s7 = smov 12  ;;  %vm4_vm3 = vcmask 1047556   ;;  %s738_s0 = inlined_call_operand.vmem [shape: f32[1,8,16,16], index: 0, kind: input, shape index: {}]   ;;  %s739_s1 = inlined_call_operand.vmem [shape: f32[8,256], index: 1, kind: output, shape index: {}]  }
   0x1   :  { %v362_v0 = vld [vmem:[%s738_s0 + $0x6] ss:$16 sm:%s75_s6]   ;;  %s83_s12 = smov 48  ;;  %s88_s13 = smov 192  ;;  %vm6_vm4 = vcmask 130048   ;;  %vm49_vm5 = vcmask 1048448  }
   0x2   :  { %v363_v1 = vld [vmem:[%s738_s0 + $0x6] ss:$16 sm:%s78_s7]   ;;  %s30_s18 = smov 3  ;;  %s33_s21 = smov 12  ;;  %vm94_vm6 = vcmask 917248   ;;  %vm139_vm7 = vcmask 786048  }
   0x3   :  { %v81_v2 = vsel %vm35_vm0, %v363_v1, %v362_v0  ;;  %v364_v3 = vld [vmem:[%s738_s0 + $0x6] ss:$16 sm:%s83_s12]   ;;  %v353_v6 = vld [vmem:[%s738_s0 + $0x7] ss:$16 sm:%s30_s18]   ;;  %s38_s22 = smov 48  ;;  %s43_s27 = smov 192 }
   0x4   :  { %v365_v4 = vld [vmem:[%s738_s0 + $0x6] ss:$16 sm:%s88_s13]   ;;  %v86_v5 = vsel %vm40_vm1, %v364_v3, %v81_v2  ;;  %v354_v8 = vld [vmem:[%s738_s0 + $0x7] ss:$16 sm:%s33_s21]   ;;  %s423_s28 = smov 96   ;;  %s97_s2 = smov 3 }
   0x5   :  { %v91_v7 = vsel %vm45_vm2, %v365_v4, %v86_v5  ;;  %v355_v9 = vld [vmem:[%s738_s0 + $0x7] ss:$16 sm:%s38_s22]   ;;  %v36_v10 = vsel %vm35_vm0, %v354_v8, %v353_v6  ;;  %s100_s3 = smov 12  ;;  %v366_v13 = vld [vmem:[%s738_s0 + $0xe] ss:$16 sm:%s97_s2]   ;;  %s105_s8 = smov 48 }
   0x6   :  { %92 = vrot.lane.b32.xlu1 %v91_v7, %s423_s28  ;;  %v356_v11 = vld [vmem:[%s738_s0 + $0x7] ss:$16 sm:%s43_s27]   ;;  %v41_v12 = vsel %vm40_vm1, %v355_v9, %v36_v10  ;;  %s110_s9 = smov 192  ;;  %s52_s14 = smov 3  ;;  %vm184_vm8 = vcmask 654848   ;;  %vm229_vm9 = vcmask 523648  }
   0x7   :  { %v367_v14 = vld [vmem:[%s738_s0 + $0xe] ss:$16 sm:%s100_s3]   ;;  %v46_v15 = vsel %vm45_vm2, %v356_v11, %v41_v12  ;;  %s55_s15 = smov 12  ;;  %s424_s16 = smov 112   ;;  %v357_v20 = vld [vmem:[%s738_s0 + $0xf] ss:$16 sm:%s52_s14]  }
   0x8   :  { %v103_v16 = vsel %vm35_vm0, %v367_v14, %v366_v13  ;;  %v368_v17 = vld [vmem:[%s738_s0 + $0xe] ss:$16 sm:%s105_s8]   ;;  %47 = vrot.lane.b32.xlu0 %v46_v15, %s424_s16  ;;  %s60_s19 = smov 48  ;;  %s65_s20 = smov 192  ;;  %vm274_vm10 = vcmask 392448   ;;  %vm319_vm11 = vcmask 261248  }
   0x9   :  { %v369_v18 = vld [vmem:[%s738_s0 + $0xe] ss:$16 sm:%s110_s9]   ;;  %v108_v19 = vsel %vm40_vm1, %v368_v17, %v103_v16  ;;  %v358_v22 = vld [vmem:[%s738_s0 + $0xf] ss:$16 sm:%s55_s15]   ;;  %s142_s25 = smov 3  ;;  %s150_s29 = smov 48 }
   0xa   :  { %v113_v21 = vsel %vm45_vm2, %v369_v18, %v108_v19  ;;  %v359_v23 = vld [vmem:[%s738_s0 + $0xf] ss:$16 sm:%s60_s19]   ;;  %v58_v24 = vsel %vm35_vm0, %v358_v22, %v357_v20  ;;  %v375_v27 = vld [vmem:[%s738_s0 + $0xd] ss:$16 sm:%s142_s25]   ;;  %s155_s5 = smov 192  ;;  %s120_s6 = smov 3 }
   0xb   :  { %114 = vrot.lane.b32.xlu1 %v113_v21, %s423_s28  ;;  %v360_v25 = vld [vmem:[%s738_s0 + $0xf] ss:$16 sm:%s65_s20]   ;;  %s145_s28 = smov 12  ;;  %v63_v26 = vsel %vm40_vm1, %v359_v23, %v58_v24  ;;  %s123_s11 = smov 12 }
   0xc   :  { %v376_v28 = vld [vmem:[%s738_s0 + $0xd] ss:$16 sm:%s145_s28]   ;;  %v68_v29 = vsel %vm45_vm2, %v360_v25, %v63_v26  ;;  %s128_s12 = smov 48  ;;  %v371_v34 = vld [vmem:[%s738_s0 + $0x5] ss:$16 sm:%s120_s6]   ;;  %s133_s15 = smov 192 }
   0xd   :  { %v148_v30 = vsel %vm35_vm0, %v376_v28, %v375_v27  ;;  %v377_v31 = vld [vmem:[%s738_s0 + $0xd] ss:$16 sm:%s150_s29]   ;;  %69 = vrot.lane.b32.xlu0 %v68_v29, %s424_s16  ;;  %s187_s20 = smov 3  ;;  %s190_s21 = smov 12 }
   0xe   :  { %v378_v32 = vld [vmem:[%s738_s0 + $0xd] ss:$16 sm:%s155_s5]   ;;  %v153_v33 = vsel %vm40_vm1, %v377_v31, %v148_v30  ;;  %v372_v36 = vld [vmem:[%s738_s0 + $0x5] ss:$16 sm:%s123_s11]   ;;  %s425_s22 = smov 80   ;;  %s195_s25 = smov 48 }
   0xf   :  { %v158_v35 = vsel %vm45_vm2, %v378_v32, %v153_v33  ;;  %v373_v37 = vld [vmem:[%s738_s0 + $0x5] ss:$16 sm:%s128_s12]   ;;  %v126_v38 = vsel %vm35_vm0, %v372_v36, %v371_v34  ;;  %s200_s26 = smov 192  ;;  %v384_v41 = vld [vmem:[%s738_s0 + $0xc] ss:$16 sm:%s187_s20]   ;;  %s165_s2 = smov 3 }
  0x10   :  { %159 = vrot.lane.b32.xlu1 %v158_v35, %s425_s22  ;;  %v374_v39 = vld [vmem:[%s738_s0 + $0x5] ss:$16 sm:%s133_s15]   ;;  %v131_v40 = vsel %vm40_vm1, %v373_v37, %v126_v38  ;;  %s168_s3 = smov 12  ;;  %s173_s8 = smov 48 }
  0x11   :  { %v385_v42 = vld [vmem:[%s738_s0 + $0xc] ss:$16 sm:%s190_s21]   ;;  %v136_v43 = vsel %vm45_vm2, %v374_v39, %v131_v40  ;;  %s178_s9 = smov 192  ;;  %v380_v48 = vld [vmem:[%s738_s0 + $0x4] ss:$16 sm:%s165_s2]   ;;  %s232_s12 = smov 3 }
  0x12   :  { %v193_v44 = vsel %vm35_vm0, %v385_v42, %v384_v41  ;;  %v386_v45 = vld [vmem:[%s738_s0 + $0xc] ss:$16 sm:%s195_s25]   ;;  %137 = vrot.lane.b32.xlu0 %v136_v43, %s425_s22  ;;  %s235_s17 = smov 12  ;;  %s240_s18 = smov 48 }
  0x13   :  { %v387_v46 = vld [vmem:[%s738_s0 + $0xc] ss:$16 sm:%s200_s26]   ;;  %v198_v47 = vsel %vm40_vm1, %v386_v45, %v193_v44  ;;  %v381_v50 = vld [vmem:[%s738_s0 + $0x4] ss:$16 sm:%s168_s3]   ;;  %s426_s19 = smov 64   ;;  %s245_s22 = smov 192 }
  0x14   :  { %v203_v49 = vsel %vm45_vm2, %v387_v46, %v198_v47  ;;  %v382_v51 = vld [vmem:[%s738_s0 + $0x4] ss:$16 sm:%s173_s8]   ;;  %v171_v52 = vsel %vm35_vm0, %v381_v50, %v380_v48  ;;  %s210_s23 = smov 3  ;;  %v393_v55 = vld [vmem:[%s738_s0 + $0xb] ss:$16 sm:%s232_s12]   ;;  %s213_s28 = smov 12 }
  0x15   :  { %204 = vrot.lane.b32.xlu1 %v203_v49, %s426_s19  ;;  %v383_v53 = vld [vmem:[%s738_s0 + $0x4] ss:$16 sm:%s178_s9]   ;;  %v176_v54 = vsel %vm40_vm1, %v382_v51, %v171_v52  ;;  %s218_s29 = smov 48  ;;  %s223_s5 = smov 192 }
  0x16   :  { %v394_v56 = vld [vmem:[%s738_s0 + $0xb] ss:$16 sm:%s235_s17]   ;;  %v181_v57 = vsel %vm45_vm2, %v383_v53, %v176_v54  ;;  %v389_v62 = vld [vmem:[%s738_s0 + $0x3] ss:$16 sm:%s210_s23]   ;;  %s277_s8 = smov 3  ;;  %s280_s9 = smov 12 }
  0x17   :  { %v238_v58 = vsel %vm35_vm0, %v394_v56, %v393_v55  ;;  %v395_v59 = vld [vmem:[%s738_s0 + $0xb] ss:$16 sm:%s240_s18]   ;;  %182 = vrot.lane.b32.xlu0 %v181_v57, %s426_s19  ;;  %s285_s14 = smov 48  ;;  %s290_s15 = smov 192 }
  0x18   :  { %v396_v60 = vld [vmem:[%s738_s0 + $0xb] ss:$16 sm:%s245_s22]   ;;  %v243_v61 = vsel %vm40_vm1, %v395_v59, %v238_v58  ;;  %v390_v0 = vld [vmem:[%s738_s0 + $0x3] ss:$16 sm:%s213_s28]   ;;  %s427_s16 = smov 48   ;;  %s255_s19 = smov 3 }
  0x19   :  { %v248_v63 = vsel %vm45_vm2, %v396_v60, %v243_v61  ;;  %v391_v1 = vld [vmem:[%s738_s0 + $0x3] ss:$16 sm:%s218_s29]   ;;  %v216_v2 = vsel %vm35_vm0, %v390_v0, %v389_v62  ;;  %v402_v5 = vld [vmem:[%s738_s0 + $0xa] ss:$16 sm:%s277_s8]   ;;  %s258_s24 = smov 12  ;;  %s263_s25 = smov 48 }
  0x1a   :  { %249 = vrot.lane.b32.xlu1 %v248_v63, %s427_s16  ;;  %v392_v3 = vld [vmem:[%s738_s0 + $0x3] ss:$16 sm:%s223_s5]   ;;  %v221_v4 = vsel %vm40_vm1, %v391_v1, %v216_v2  ;;  %s268_s30 = smov 192  ;;  %s322_s4 = smov 3 }
  0x1b   :  { %v403_v6 = vld [vmem:[%s738_s0 + $0xa] ss:$16 sm:%s280_s9]   ;;  %v226_v7 = vsel %vm45_vm2, %v392_v3, %v221_v4  ;;  %v398_v12 = vld [vmem:[%s738_s0 + $0x2] ss:$16 sm:%s255_s19]   ;;  %s325_s5 = smov 12  ;;  %s330_s10 = smov 48 }
  0x1c   :  { %v283_v8 = vsel %vm35_vm0, %v403_v6, %v402_v5  ;;  %v404_v9 = vld [vmem:[%s738_s0 + $0xa] ss:$16 sm:%s285_s14]   ;;  %227 = vrot.lane.b32.xlu0 %v226_v7, %s427_s16  ;;  %s335_s11 = smov 192  ;;  %s428_s12 = smov 32  }
  0x1d   :  { %v405_v10 = vld [vmem:[%s738_s0 + $0xa] ss:$16 sm:%s290_s15]   ;;  %v288_v11 = vsel %vm40_vm1, %v404_v9, %v283_v8  ;;  %v399_v14 = vld [vmem:[%s738_s0 + $0x2] ss:$16 sm:%s258_s24]   ;;  %s300_s15 = smov 3  ;;  %s303_s20 = smov 12 }
  0x1e   :  { %v293_v13 = vsel %vm45_vm2, %v405_v10, %v288_v11  ;;  %v400_v15 = vld [vmem:[%s738_s0 + $0x2] ss:$16 sm:%s263_s25]   ;;  %v261_v16 = vsel %vm35_vm0, %v399_v14, %v398_v12  ;;  %v411_v19 = vld [vmem:[%s738_s0 + $0x9] ss:$16 sm:%s322_s4]   ;;  %s308_s21 = smov 48  ;;  %s313_s26 = smov 192 }
  0x1f   :  { %294 = vrot.lane.b32.xlu1 %v293_v13, %s428_s12  ;;  %v401_v17 = vld [vmem:[%s738_s0 + $0x2] ss:$16 sm:%s268_s30]   ;;  %v266_v18 = vsel %vm40_vm1, %v400_v15, %v261_v16  ;;  %v2_v27 = vld [vmem:[%s738_s0] ss:$8 sm:$0xf]   ;;  %s429_s6 = smov 16  }
  0x20   :  { %v412_v20 = vld [vmem:[%s738_s0 + $0x9] ss:$16 sm:%s325_s5]   ;;  %v271_v21 = vsel %vm45_vm2, %v401_v17, %v266_v18  ;;  %v407_v26 = vld [vmem:[%s738_s0 + $0x1] ss:$16 sm:%s300_s15]  }
  0x21   :  { %v328_v22 = vsel %vm35_vm0, %v412_v20, %v411_v19  ;;  %v413_v23 = vld [vmem:[%s738_s0 + $0x9] ss:$16 sm:%s330_s10]   ;;  %272 = vrot.lane.b32.xlu0 %v271_v21, %s428_s12  ;;  %v3_v33 = vld [vmem:[%s738_s0] ss:$8 sm:$0xf0]  }
  0x22   :  { %v414_v24 = vld [vmem:[%s738_s0 + $0x9] ss:$16 sm:%s335_s11]   ;;  %v333_v25 = vsel %vm40_vm1, %v413_v23, %v328_v22  ;;  %v408_v29 = vld [vmem:[%s738_s0 + $0x1] ss:$16 sm:%s303_s20]   ;;  %v5_v35 = vsel %vm4_vm3, %v3_v33, %v2_v27 }
  0x23   :  { %v338_v28 = vsel %vm45_vm2, %v414_v24, %v333_v25  ;;  %v409_v30 = vld [vmem:[%s738_s0 + $0x1] ss:$16 sm:%s308_s21]   ;;  %v306_v31 = vsel %vm35_vm0, %v408_v29, %v407_v26  ;;  %v347_v36 = vld [vmem:[%s738_s0 + $0x40] ss:$8 sm:$0xf]  }
  0x24   :  { %339 = vrot.lane.b32.xlu1 %v338_v28, %s429_s6  ;;  %v410_v32 = vld [vmem:[%s738_s0 + $0x1] ss:$16 sm:%s313_s26]   ;;  %v311_v34 = vsel %vm40_vm1, %v409_v30, %v306_v31  ;;  %v348_v37 = vld [vmem:[%s738_s0 + $0x40] ss:$8 sm:$0xf0]  }
  0x25   :  { %v316_v38 = vsel %vm45_vm2, %v410_v32, %v311_v34  ;;  %7 = vst.msk [vmem:[%s739_s1] ss:$8 sm:$0x3] %vm6_vm4, %v5_v35   ;;  %344 = vst.msk [vmem:[%s739_s1 - $0xf] ss:$8 sm:$0xc] %vm6_vm4, %v5_v35   ;;  %v19_v39 = vsel %vm4_vm3, %v348_v37, %v347_v36 }
  0x26   :  { %345 = vst.msk [vmem:[%s739_s1 - $0x1e] ss:$8 sm:$0x30] %vm6_vm4, %v5_v35   ;;  %346 = vst.msk [vmem:[%s739_s1 - $0x2d] ss:$8 sm:$0xc0] %vm6_vm4, %v5_v35   ;;  %317 = vrot.lane.b32.xlu0 %v316_v38, %s429_s6 }
  0x27   :  { %349 = vst.msk [vmem:[%s739_s1 + $0x4] ss:$8 sm:$0x3] %vm6_vm4, %v19_v39   ;;  %350 = vst.msk [vmem:[%s739_s1 - $0xb] ss:$8 sm:$0xc] %vm6_vm4, %v19_v39  }
  0x28   :  { %351 = vst.msk [vmem:[%s739_s1 - $0x1a] ss:$8 sm:$0x30] %vm6_vm4, %v19_v39   ;;  %352 = vst.msk [vmem:[%s739_s1 - $0x29] ss:$8 sm:$0xc0] %vm6_vm4, %v19_v39  }
  0x78   :  { %v93_v40 = vpop.permute.xlu1 %92  }
  0x7a   :  { %v48_v41 = vpop.permute.xlu0 %47  }
  0x7b   :  { %50 = vst.msk [vmem:[%s739_s1] sm:$0xff] %vm49_vm5, %v48_v41  }
  0x7c   :  { %95 = vst.msk [vmem:[%s739_s1] sm:$0xff] %vm94_vm6, %v93_v40  }
  0x7d   :  { %v115_v42 = vpop.permute.xlu1 %114  }
  0x7f   :  { %v70_v43 = vpop.permute.xlu0 %69  }
  0x80   :  { %361 = vst.msk [vmem:[%s739_s1 + $0x8] sm:$0xff] %vm49_vm5, %v70_v43  }
  0x81   :  { %370 = vst.msk [vmem:[%s739_s1 + $0x8] sm:$0xff] %vm94_vm6, %v115_v42  }
  0x82   :  { %v160_v44 = vpop.permute.xlu1 %159  }
  0x83   :  { %379 = vst.msk [vmem:[%s739_s1 + $0x8] sm:$0xff] %vm139_vm7, %v160_v44  }
  0x84   :  { %v138_v45 = vpop.permute.xlu0 %137  }
  0x85   :  { %140 = vst.msk [vmem:[%s739_s1] sm:$0xff] %vm139_vm7, %v138_v45  }
  0x87   :  { %v205_v46 = vpop.permute.xlu1 %204  }
  0x88   :  { %388 = vst.msk [vmem:[%s739_s1 + $0x8] sm:$0xff] %vm184_vm8, %v205_v46  }
  0x89   :  { %v183_v47 = vpop.permute.xlu0 %182  }
  0x8a   :  { %185 = vst.msk [vmem:[%s739_s1] sm:$0xff] %vm184_vm8, %v183_v47  }
  0x8c   :  { %v250_v48 = vpop.permute.xlu1 %249  }
  0x8d   :  { %397 = vst.msk [vmem:[%s739_s1 + $0x8] sm:$0xff] %vm229_vm9, %v250_v48  }
  0x8e   :  { %v228_v49 = vpop.permute.xlu0 %227  }
  0x8f   :  { %230 = vst.msk [vmem:[%s739_s1] sm:$0xff] %vm229_vm9, %v228_v49  }
  0x91   :  { %v295_v50 = vpop.permute.xlu1 %294  }
  0x92   :  { %406 = vst.msk [vmem:[%s739_s1 + $0x8] sm:$0xff] %vm274_vm10, %v295_v50  }
  0x93   :  { %v273_v51 = vpop.permute.xlu0 %272  }
  0x94   :  { %275 = vst.msk [vmem:[%s739_s1] sm:$0xff] %vm274_vm10, %v273_v51  }
  0x96   :  { %v340_v52 = vpop.permute.xlu1 %339  }
  0x97   :  { %415 = vst.msk [vmem:[%s739_s1 + $0x8] sm:$0xff] %vm319_vm11, %v340_v52  }
  0x98   :  { %v318_v53 = vpop.permute.xlu0 %317  }
  0x99   :  { %320 = vst.msk [vmem:[%s739_s1] sm:$0xff] %vm319_vm11, %v318_v53  }

// kernel: model_block_forward.1
= control target key start
LH: loop header
LB: loop body
LE: loop exit
PB: predicated region body
PF: predicated region fallthrough
CT: control target
= control target key end

     0   :  { %v550_v2 = vmov 0.0   ;;  %vm29_vm0 = vcmask 64512   ;;  %s551_s9 = smov 16   ;;  %s552_s10 = smov 17   ;;  %v558_v10 = vmov 0   ;;  %v112_v13 = vlaneseq  ;;  %s740_s0 = inlined_call_operand.vmem [shape: f32[8,256], index: 0, kind: input, shape index: {}]   ;;  %s741_s2 = inlined_call_operand.vmem [shape: f32[8,8], index: 2, kind: input, shape index: {}]   ;;  %s742_s1 = inlined_call_operand.vmem [shape: f32[8,256], index: 1, kind: input, shape index: {}]   ;;  %s743_s4 = inlined_call_operand.vmem [shape: f32[16,1], index: 4, kind: input, shape index: {}]   ;;  %s744_s6 = inlined_call_operand.vmem [shape: f32[16,256], index: 6, kind: input, shape index: {}]   ;;  %s745_s3 = inlined_call_operand.vmem [shape: f32[16,72], index: 3, kind: input, shape index: {}]   ;;  %s746_s5 = inlined_call_operand.vmem [shape: f32[8,16], index: 5, kind: input, shape index: {}]   ;;  %s747_s7 = inlined_call_operand.vmem [shape: f32[8,256], index: 7, kind: output, shape index: {}]  }
   0x1   :  { %v603_v0 = vld [vmem:[%s740_s0 + $0x8] sm:$0xff]  ;;  %v608_v1 = vld [vmem:[%s740_s0] sm:$0xff]  ;;  %97 = vmatprep.mubr.f32.mxu0 %v550_v2  ;;  %406 = vmatprep.mubr.f32.mxu1 %v550_v2  ;;  %s553_s11 = smov 15   ;;  %s554_s12 = smov 1   ;;  %vm335_vm9 = vcmask 588800   ;;  %vm424_vm10 = vcmask 130048  }
   0x2   :  { %v28_v3 = vld [vmem:[%s741_s2] sm:$0xff]  ;;  %33 = vmatprep.subr.mxu0 %v603_v0  ;;  %v105_v8 = vld [vmem:[%s742_s1 + $0x8] sm:$0xff]  ;;  %s556_s13 = smov 113   ;;  %s557_s14 = smov 112   ;;  %548 = vset.pattern.permute.xlu0 %v558_v10  ;;  %v120_v16 = vshrl.u32 %v112_v13, 7  ;;  %v650_v17 = vand.u32 127, %v112_v13 }
   0x3   :  { %34 = vmatpush1.msra.mxu0 %v608_v1  ;;  %v104_v4 = vld [vmem:[%s742_s1] sm:$0xff]  ;;  %s555_s1 = smov 127   ;;  %549 = vset.pattern.permute.xlu1 %v558_v10  ;;  %s559_s15 = smov 111   ;;  %v324_v12 = vld [vmem:[%s743_s4 + $0x8] sm:$0xff] }
   0x4   :  { %507 = vmatmul.mubr.msk.f32.vlgmr.msra.gmra.mrb[0].mxu0 %vm29_vm0, %v28_v3  ;;  %v323_v11 = vld [vmem:[%s743_s4] sm:$0xff]  ;;  %v652_v19 = vsub.s32 0, %v120_v16  ;;  %v654_v21 = vsub.s32 1, %v120_v16  ;;  %vm137_vm1 = vcmp.lt.s32.totalorder %v650_v17, 16  ;;  %vm161_vm2 = vcmp.lt.s32.totalorder %v650_v17, 15 }
   0x5   :  { %492 = vmatprep.mubr.f32.mxu0 %v550_v2  ;;  %v508_v22 = vld [vmem:[%s744_s6 + $0x1] ss:$8 sm:$0x3]  ;;  %v510_v23 = vld [vmem:[%s744_s6 + $0x3] ss:$8 sm:$0x3] }
   0x6   :  { %v117_v24 = vld [vmem:[%s744_s6] ss:$8 sm:$0x3]  ;;  %v146_v25 = vrot.slane %v508_v22, %v652_v19  ;;  %v509_v27 = vld [vmem:[%s744_s6 + $0x2] ss:$8 sm:$0x3]  ;;  %v150_v29 = vrot.slane %v508_v22, %v654_v21  ;;  %v198_v33 = vrot.slane %v510_v23, %v654_v21  ;;  %v194_v37 = vrot.slane %v510_v23, %v652_v19 }
   0x7   :  { %vm185_vm3 = vcmp.lt.s32.totalorder %v650_v17, 1  ;;  %v511_v32 = vld [vmem:[%s744_s6 + $0x5] ss:$8 sm:$0x3]  ;;  %vm114_vm4 = vcmp.lt.s32.totalorder %v650_v17, 17  ;;  %v122_v34 = vrot.slane %v117_v24, %v652_v19  ;;  %v126_v35 = vrot.slane %v117_v24, %v654_v21 }
   0x8   :  { %v174_v36 = vrot.slane %v509_v27, %v654_v21  ;;  %vm211_vm5 = vcmp.lt.s32.totalorder %v650_v17, 127  ;;  %v224_v41 = vrot.slane %v511_v32, %v654_v21  ;;  %v170_v51 = vrot.slane %v509_v27, %v652_v19  ;;  %v512_v3 = vld [vmem:[%s744_s6 + $0x6] ss:$8 sm:$0x3] }
   0x9   :  { %v220_v59 = vrot.slane %v511_v32, %v652_v19  ;;  %vm235_vm6 = vcmp.lt.s32.totalorder %v650_v17, 113  ;;  %vm259_vm7 = vcmp.lt.s32.totalorder %v650_v17, 112  ;;  %vm283_vm8 = vcmp.lt.s32.totalorder %v650_v17, 111 }
  0xd7   :  { %v99_v5 = vpop.f32.mrb[0].mxu0 }
  0xd8   :  { %v621_v6 = vsub.f32 %v99_v5, %v104_v4  ;;  %v101_v7 = vpop.f32.mrb[1].mxu0  ;;  %v513_v5 = vld [vmem:[%s744_s6 + $0x7] ss:$8 sm:$0x3] }
  0xd9   :  { %v628_v9 = vsub.f32 %v101_v7, %v105_v8  ;;  %v272_v16 = vrot.slane %v513_v5, %v654_v21 }
  0xda   :  { %133 = vrot.lane.b32.xlu1 %v621_v6, %s551_s9  ;;  %108 = vrot.lane.b32.xlu0 %v621_v6, %s552_s10 }
  0xde   :  { %157 = vrot.lane.b32.xlu0 %v621_v6, %s553_s11  ;;  %135 = vrot.lane.b32.xlu1 %v628_v9, %s551_s9 }
  0xe2   :  { %181 = vrot.lane.b32.xlu0 %v621_v6, %s554_s12  ;;  %159 = vrot.lane.b32.xlu1 %v628_v9, %s553_s11 }
  0xe6   :  { %183 = vrot.lane.b32.xlu1 %v628_v9, %s554_s12  ;;  %110 = vrot.lane.b32.xlu0 %v628_v9, %s552_s10 }
  0xea   :  { %209 = vrot.lane.b32.xlu1 %v628_v9, %s555_s1  ;;  %207 = vrot.lane.b32.xlu0 %v621_v6, %s555_s1 }
  0xee   :  { %233 = vrot.lane.b32.xlu1 %v628_v9, %s556_s13  ;;  %231 = vrot.lane.b32.xlu0 %v621_v6, %s556_s13 }
  0xf2   :  { %257 = vrot.lane.b32.xlu1 %v628_v9, %s557_s14  ;;  %255 = vrot.lane.b32.xlu0 %v621_v6, %s557_s14 }
  0xf6   :  { %281 = vrot.lane.b32.xlu1 %v628_v9, %s559_s15  ;;  %279 = vrot.lane.b32.xlu0 %v621_v6, %s559_s15 }
  0xfa   :  { %327 = vperm.xlu0 %548, %v323_v11   ;;  %332 = vperm.xlu1 %549, %v324_v12   ;;  %v244_v11 = vrot.slane %v512_v3, %v652_v19  ;;  %v248_v12 = vrot.slane %v512_v3, %v654_v21 }
 0x14c   :  { %v134_v14 = vpop.permute.xlu1 %133  ;;  %v109_v15 = vpop.permute.xlu0 %108 }
 0x150   :  { %v158_v18 = vpop.permute.xlu0 %157  ;;  %v136_v20 = vpop.permute.xlu1 %135 }
 0x151   :  { %v138_v30 = vsel %vm137_vm1, %v134_v14, %v136_v20  ;;  %v139_v31 = vsel %vm137_vm1, %v136_v20, %v134_v14 }
 0x152   :  { %v153_v38 = vmul.f32 %v146_v25, %v139_v31  ;;  %v154_v42 = vmul.f32 %v150_v29, %v138_v30 }
 0x154   :  { %v182_v26 = vpop.permute.xlu0 %181  ;;  %v160_v28 = vpop.permute.xlu1 %159 }
 0x155   :  { %v162_v43 = vsel %vm161_vm2, %v158_v18, %v160_v28  ;;  %v163_v52 = vsel %vm161_vm2, %v160_v28, %v158_v18  ;;  %v514_v18 = vld [vmem:[%s744_s6 + $0x10] ss:$8 sm:$0x3] }
 0x156   :  { %v178_v53 = vmul.f32 %v174_v36, %v162_v43  ;;  %v177_v4 = vmul.f32 %v170_v51, %v163_v52  ;;  %v296_v27 = vrot.slane %v514_v18, %v654_v21  ;;  %v292_v36 = vrot.slane %v514_v18, %v652_v19 }
 0x158   :  { %v184_v39 = vpop.permute.xlu1 %183  ;;  %v111_v40 = vpop.permute.xlu0 %110 }
 0x159   :  { %v186_v44 = vsel %vm185_vm3, %v182_v26, %v184_v39  ;;  %v115_v45 = vsel %vm114_vm4, %v109_v15, %v111_v40  ;;  %v116_v46 = vsel %vm114_vm4, %v111_v40, %v109_v15  ;;  %v187_v47 = vsel %vm185_vm3, %v184_v39, %v182_v26  ;;  %v303_v39 = vld [vmem:[%s745_s3] sm:$0xff] }
 0x15a   :  { %v202_v48 = vmul.f32 %v198_v33, %v186_v44  ;;  %v129_v49 = vmul.f32 %v122_v34, %v116_v46  ;;  %v130_v50 = vmul.f32 %v126_v35, %v115_v45  ;;  %v201_v58 = vmul.f32 %v194_v37, %v187_v47 }
 0x15b   :  { %v268_v15 = vrot.slane %v513_v5, %v652_v19  ;;  %v304_v19 = vld [vmem:[%s745_s3 + $0x8] sm:$0xff] }
 0x15c   :  { %v210_v54 = vpop.permute.xlu1 %209  ;;  %v208_v55 = vpop.permute.xlu0 %207  ;;  %v518_v56 = vpack.c.bf16 %v154_v42, %v130_v50  ;;  %v520_v57 = vpack.c.bf16 %v153_v38, %v129_v49  ;;  %v522_v63 = vpack.c.bf16 %v202_v48, %v178_v53  ;;  %v524_v13 = vpack.c.bf16 %v201_v58, %v177_v4 }
 0x15d   :  { %v213_v60 = vsel %vm211_vm5, %v210_v54, %v208_v55  ;;  %v212_v61 = vsel %vm211_vm5, %v208_v55, %v210_v54  ;;  %v423_v54 = vld [vmem:[%s746_s5] sm:$0xff] }
 0x15e   :  { %v228_v62 = vmul.f32 %v224_v41, %v213_v60  ;;  %519 = vmatprep.subr.bf16.mxu1 %v518_v56  ;;  %v227_v10 = vmul.f32 %v220_v59, %v212_v61 }
 0x15f   :  { %521 = vmatpush1.bf16.msra.mxu1 %v520_v57 }
 0x160   :  { %v234_v7 = vpop.permute.xlu1 %233  ;;  %523 = vmatprep.subr.bf16.mxu1 %v522_v63  ;;  %v232_v8 = vpop.permute.xlu0 %231  ;;  %v526_v14 = vpack.c.bf16 %v228_v62, %v628_v9  ;;  %v528_v26 = vpack.c.bf16 %v227_v10, %v621_v6 }
 0x161   :  { %v236_v20 = vsel %vm235_vm6, %v232_v8, %v234_v7  ;;  %v237_v22 = vsel %vm235_vm6, %v234_v7, %v232_v8 }
 0x162   :  { %v251_v28 = vmul.f32 %v244_v11, %v236_v20  ;;  %v252_v29 = vmul.f32 %v248_v12, %v237_v22 }
 0x163   :  { %525 = vmatpush1.bf16.msra.mxu1 %v524_v13 }
 0x164   :  { %v258_v23 = vpop.permute.xlu1 %257  ;;  %527 = vmatprep.subr.bf16.mxu1 %v526_v14  ;;  %v256_v24 = vpop.permute.xlu0 %255 }
 0x165   :  { %v260_v25 = vsel %vm259_vm7, %v256_v24, %v258_v23  ;;  %v261_v9 = vsel %vm259_vm7, %v258_v23, %v256_v24 }
 0x166   :  { %v275_v30 = vmul.f32 %v268_v15, %v260_v25  ;;  %v276_v31 = vmul.f32 %v272_v16, %v261_v9 }
 0x167   :  { %529 = vmatpush1.bf16.msra.mxu1 %v528_v26 }
 0x168   :  { %v282_v32 = vpop.permute.xlu1 %281  ;;  %v280_v33 = vpop.permute.xlu0 %279  ;;  %v530_v34 = vpack.c.bf16 %v276_v31, %v252_v29  ;;  %v532_v35 = vpack.c.bf16 %v275_v30, %v251_v28 }
 0x169   :  { %v285_v37 = vsel %vm283_vm8, %v282_v32, %v280_v33  ;;  %v284_v38 = vsel %vm283_vm8, %v280_v33, %v282_v32 }
 0x16a   :  { %v300_v6 = vmul.f32 %v296_v27, %v285_v37  ;;  %531 = vmatprep.subr.bf16.mxu1 %v530_v34  ;;  %v299_v21 = vmul.f32 %v292_v36, %v284_v38 }
 0x16b   :  { %533 = vmatpush1.bf16.msra.mxu1 %v532_v35 }
 0x16c   :  { %358 = vmatprep.subr.mxu1 %v300_v6 }
 0x16f   :  { %359 = vmatpush1.msra.mxu1 %v299_v21 }
 0x170   :  { %515 = vmatmul.mubr.msk.f32.vlgmr.msra.gmra.mrb[0].mxu1 %vm335_vm9, %v303_v39 }
 0x171   :  { %412 = vmatprep.mubr.f32.mxu1 %v550_v2 }
 0x174   :  { %516 = vmatmul.mubr.msk.f32.gmra.mrb[2].mxu1 %vm335_vm9, %v304_v19 }
 0x179   :  { %v328_v40 = vpop.permute.xlu0 %327  ;;  %v333_v42 = vpop.permute.xlu1 %332 }
 0x243   :  { %v408_v17 = vpop.f32.mrb[0].mxu1 }
 0x244   :  { %v410_v41 = vpop.f32.mrb[1].mxu1  ;;  %v409_v43 = vadd.f32 %v408_v17, %v328_v40 }
 0x245   :  { %v411_v44 = vadd.f32 %v410_v41, %v328_v40 }
 0x246   :  { %v419_v49 = vmax.f32 %v409_v43, 0.0 }
 0x247   :  { %v414_v45 = vpop.f32.mrb[2].mxu1  ;;  %v420_v51 = vmax.f32 %v411_v44, 0.0 }
 0x248   :  { %v415_v46 = vadd.f32 %v414_v45, %v333_v42  ;;  %v416_v47 = vpop.f32.mrb[3].mxu1 }
 0x249   :  { %v417_v48 = vadd.f32 %v416_v47, %v333_v42 }
 0x24a   :  { %v421_v50 = vmax.f32 %v415_v46, 0.0 }
 0x24b   :  { %v422_v52 = vmax.f32 %v417_v48, 0.0 }
 0x24c   :  { %v536_v2 = vpack.c.bf16 %v421_v50, %v419_v49 }
 0x24d   :  { %v534_v53 = vpack.c.bf16 %v422_v52, %v420_v51 }
 0x24f   :  { %535 = vmatprep.subr.bf16.mxu0 %v534_v53 }
 0x250   :  { %537 = vmatpush1.bf16.msra.mxu0 %v536_v2 }
 0x253   :  { %517 = vmatmul.mubr.msk.f32.vlgmr.msra.gmra.mrb[2].mxu0 %vm424_vm10, %v423_v54 }
 0x326   :  { %v494_v55 = vpop.f32.mrb[2].mxu0 }
 0x327   :  { %v499_v56 = vadd.f32 %v494_v55, %v608_v1  ;;  %v496_v57 = vpop.f32.mrb[3].mxu0 }
 0x328   :  { %v500_v58 = vadd.f32 %v496_v57, %v603_v0 }
 0x329   :  { %501 = vst [vmem:[%s747_s7] sm:$0xff] %v499_v56 }
 0x32a   :  { %502 = vst [vmem:[%s747_s7 + $0x8] sm:$0xff] %v500_v58 }

</bundles_post_ra>
